<compile_context>
chip_gen: v7x
topology: tpu7x:2x2x1
jax: 0.10.0
libtpu: 0.0.40
codegen_flags: <defaults>
</compile_context>

<pallas_src>
import functools

import numpy as np
import jax
import jax.numpy as jnp
from jax.experimental import pallas as pl
from jax.experimental.pallas import tpu as pltpu


_FUSE_MAX_N = 512          # below this, fuse H construction into the triplet kernel
_TILE_G = 256              # H-block tile for the large-N path


def _round_up(x, m):
    return ((x + m - 1) // m) * m


def _next_pow2(x):
    return 1 if x <= 1 else 1 << (int(x) - 1).bit_length()


def _vmem_budget_bytes():
    """~75% of physical VMEM: ~96 MiB on v5e/v6e (128 MiB), ~48 MiB on v7x (64 MiB)."""
    try:
        cap = int(pltpu.get_tpu_info().vmem_capacity_bytes)
    except Exception:
        cap = 64 * 1024 * 1024
    return (cap * 3) // 4


# ---------------------------------------------------------------------------
# Shared per-tile triplet math.
#   diff[t] = ap - an = sum_i s_a[i,t] * (H @ m_pn)[i,t]
# with H[i,j] = sq[j] - 2*G[i,j], m_pn = onehot(p) - onehot(n), s_a = onehot(a).
# Triplets sit on the lane axis; the only large op is one MXU matmul.
# ---------------------------------------------------------------------------
def _triplet_tile_body(n_pad, tile_t, margin, tcount_ref, h, idx_ref, out_ref):
    a_row = idx_ref[0:1, :]                                     # (1, TILE_T) int32
    p_row = idx_ref[1:2, :]
    n_row = idx_ref[2:3, :]

    iota_n = jax.lax.broadcasted_iota(jnp.int32, (n_pad, tile_t), 0)
    s_a = (iota_n == a_row).astype(jnp.float32)                 # (N, TILE_T)
    m_pn = ((iota_n == p_row).astype(jnp.float32)
            - (iota_n == n_row).astype(jnp.float32))            # (N, TILE_T)

    # One MXU matmul per tile; the row gather of H is a masked column-reduce.
    c = jnp.dot(h, m_pn, preferred_element_type=jnp.float32)    # (N, TILE_T)
    diff = jnp.sum(s_a * c, axis=0, keepdims=True)              # (1, TILE_T) == ap - an
    losses = jnp.maximum(diff + jnp.float32(margin), 0.0)

    # Mask padded triplet slots (global index >= T) BEFORE the reduction.
    lane = jax.lax.broadcasted_iota(jnp.int32, (1, tile_t), 1)
    valid = (pl.program_id(0) * tile_t + lane) < tcount_ref[0]
    masked = jnp.where(valid, losses, 0.0)

    # Per-tile partial sum: writeback is 4 bytes per tile, not 4*TILE_T.
    out_ref[...] = jnp.sum(masked, axis=1, keepdims=True)[None, :, :]   # (1, 1, 1)


# ---------------------------------------------------------------------------
# Fused kernel (small N): build H into VMEM scratch at grid step 0, then run
# the per-tile triplet math against the resident scratch.  Grid axis must be
# "arbitrary" so the scratch built at step 0 is visible to every later step
# (on v7x a "parallel" axis would give each core its own, uninitialized copy).
# ---------------------------------------------------------------------------
def _fused_kernel(n_pad, tile_t, margin,
                  tcount_ref, emb_ref, idx_ref, out_ref, h_sc):
    @pl.when(pl.program_id(0) == 0)
    def _():
        e = emb_ref[...]                                        # native dtype operands
        g = jax.lax.dot_general(e, e, (((1,), (1,)), ((), ())),
                                preferred_element_type=jnp.float32)   # (N, N) f32 acc
        rows = jax.lax.broadcasted_iota(jnp.int32, (n_pad, n_pad), 0)
        cols = jax.lax.broadcasted_iota(jnp.int32, (n_pad, n_pad), 1)
        eye = (rows == cols).astype(jnp.float32)
        sq_row = jnp.sum(g * eye, axis=0, keepdims=True)        # (1, N): ||e_j||^2 = G[j,j]
        h_sc[...] = sq_row - 2.0 * g                            # H[i,j] = sq[j] - 2 G[i,j]

    _triplet_tile_body(n_pad, tile_t, margin, tcount_ref, h_sc[...], idx_ref, out_ref)


# ---------------------------------------------------------------------------
# Large-N path, kernel 1: tiled H = sq_row - 2 * (emb @ emb.T), f32 accumulation,
# native-dtype matmul operands.  Grid over (i, j) blocks keeps VMEM bounded and
# the MXU pipelined (no whole-array residency requirement).
# ---------------------------------------------------------------------------
def _h_kernel(emb_i_ref, emb_j_ref, sqj_ref, h_ref):
    g = jax.lax.dot_general(emb_i_ref[...], emb_j_ref[...],
                            (((1,), (1,)), ((), ())),
                            preferred_element_type=jnp.float32)       # (TG, TG)
    h_ref[...] = sqj_ref[...] - 2.0 * g                               # (1, TG) broadcast


# Large-N path, kernel 2: triplet tiles against H resident in VMEM as a single
# (un-pipelined) copy — no double buffering of the N^2 array.
def _triplet_kernel(n_pad, tile_t, margin, tcount_ref, h_ref, idx_ref, out_ref):
    _triplet_tile_body(n_pad, tile_t, margin, tcount_ref, h_ref[...], idx_ref, out_ref)


# ---------------------------------------------------------------------------
# Wrapper
# ---------------------------------------------------------------------------
def online_triplet_loss_pallas(embeddings, triplets, margin):
    """embeddings: (N, D) float array; triplets: (T, 3) int array (host side).

    Returns (mean hinge loss over the triplets, number of triplets)."""
    n, d = int(embeddings.shape[0]), int(embeddings.shape[1])
    t_count = int(triplets.shape[0])
    if t_count == 0:
        # TODO(synk): PyTorch's mean over an empty tensor is NaN; we return 0.
        return jnp.float32(0.0), 0

    # Triplet tiling: bucket T to the next power of two (bounded recompiles),
    # TILE_T a multiple of 256 (full v6e/v7x MXU width), >= 4 tiles when large
    # enough so a "parallel" grid axis can shard across v7x's two TensorCores.
    t_pad = max(256, _next_pow2(t_count))
    tile_t = min(1024, max(256, t_pad // 4))
    num_tiles = t_pad // tile_t

    tri = jnp.asarray(triplets, dtype=jnp.int32)                     # (T, 3)
    idx = jnp.pad(tri.T, ((0, 0), (0, t_pad - t_count)))             # (3, T_pad) on device
    t_scalar = jnp.asarray([t_count], dtype=jnp.int32)               # -> SMEM prefetch

    vmem_limit = _vmem_budget_bytes()

    if n <= _FUSE_MAX_N:
        # ---- fused single-kernel path (small batches) ----
        n_pad = _round_up(n, 8)
        emb_p = embeddings if n_pad == n else jnp.pad(embeddings, ((0, n_pad - n), (0, 0)))

        kernel = functools.partial(_fused_kernel, n_pad, tile_t, float(margin))
        partials = pl.pallas_call(
            kernel,
            out_shape=jax.ShapeDtypeStruct((num_tiles, 1, 1), jnp.float32),
            grid_spec=pltpu.PrefetchScalarGridSpec(
                num_scalar_prefetch=1,                                # T -> SMEM
                grid=(num_tiles,),
                in_specs=[
                    pl.BlockSpec((n_pad, d), lambda t, tc: (0, 0)),   # resident embeddings
                    pl.BlockSpec((3, tile_t), lambda t, tc: (0, t)),  # lane-dense index tile
                ],
                out_specs=pl.BlockSpec((1, 1, 1), lambda t, tc: (t, 0, 0)),
                scratch_shapes=[pltpu.VMEM((n_pad, n_pad), jnp.float32)],   # H scratch
            ),
            compiler_params=pltpu.CompilerParams(
                dimension_semantics=("arbitrary",),   # scratch H must persist across steps
                vmem_limit_bytes=vmem_limit,
            ),
        )(t_scalar, emb_p, idx)
    else:
        # ---- two-kernel path (large batches) ----
        # TODO(synk): for N beyond ~2048 on v7x (64 MiB VMEM), block H over N with a
        # second "arbitrary" grid axis accumulating partial diffs instead of keeping
        # the full (N, N) matrix resident; also tile K when D is very large.
        tile_g = _TILE_G
        n_pad = _round_up(n, tile_g)
        emb_p = embeddings if n_pad == n else jnp.pad(embeddings, ((0, n_pad - n), (0, 0)))
        sq_row = jnp.sum(jnp.square(emb_p.astype(jnp.float32)), axis=1)[None, :]  # (1, N_pad)

        h = pl.pallas_call(
            _h_kernel,
            out_shape=jax.ShapeDtypeStruct((n_pad, n_pad), jnp.float32),
            grid=(n_pad // tile_g, n_pad // tile_g),
            in_specs=[pl.BlockSpec((tile_g, d), lambda i, j: (i, 0)),
                      pl.BlockSpec((tile_g, d), lambda i, j: (j, 0)),
                      pl.BlockSpec((1, tile_g), lambda i, j: (0, j))],
            out_specs=pl.BlockSpec((tile_g, tile_g), lambda i, j: (i, j)),
            compiler_params=pltpu.CompilerParams(
                dimension_semantics=("parallel", "parallel"),
                vmem_limit_bytes=vmem_limit,
            ),
        )(emb_p, emb_p, sq_row)

        kernel = functools.partial(_triplet_kernel, n_pad, tile_t, float(margin))
        partials = pl.pallas_call(
            kernel,
            out_shape=jax.ShapeDtypeStruct((num_tiles, 1, 1), jnp.float32),
            grid_spec=pltpu.PrefetchScalarGridSpec(
                num_scalar_prefetch=1,
                grid=(num_tiles,),
                in_specs=[
                    # H resident in VMEM as a single copy (not pipelined/double-buffered).
                    pl.BlockSpec(memory_space=pltpu.MemorySpace.VMEM),
                    pl.BlockSpec((3, tile_t), lambda t, tc: (0, t)),
                ],
                out_specs=pl.BlockSpec((1, 1, 1), lambda t, tc: (t, 0, 0)),
            ),
            compiler_params=pltpu.CompilerParams(
                dimension_semantics=("parallel",),                    # megacore-friendly
                vmem_limit_bytes=vmem_limit,
            ),
        )(t_scalar, h, idx)

    mean_loss = jnp.sum(partials) / jnp.float32(t_count)
    return mean_loss, t_count


# ---------------------------------------------------------------------------
# Host-side triplet selection (equivalent of an AllTripletSelector).
# TODO(synk): data-dependent, variable-length index generation stays on host,
# exactly as the PyTorch triplet_selector does.
# ---------------------------------------------------------------------------
def all_triplets_selector(labels_np):
    trips = []
    n = len(labels_np)
    for a in range(n):
        for p in range(n):
            if p == a or labels_np[p] != labels_np[a]:
                continue
            for neg in range(n):
                if labels_np[neg] == labels_np[a]:
                    continue
                trips.append((a, p, neg))
    return np.asarray(trips, dtype=np.int32).reshape(-1, 3)


def reference_loss(embeddings, triplets, margin):
    emb = embeddings.astype(jnp.float32)
    a = emb[triplets[:, 0]]
    p = emb[triplets[:, 1]]
    n = emb[triplets[:, 2]]
    ap = jnp.sum((a - p) ** 2, axis=1)
    an = jnp.sum((a - n) ** 2, axis=1)
    return jnp.mean(jnp.maximum(ap - an + margin, 0.0))


if __name__ == "__main__":
    margin = 1.0
    N, D = 8, 32  # batch of 8 embeddings, hidden dim 32

    key = jax.random.PRNGKey(0)
    embeddings = jax.random.normal(key, (N, D), dtype=jnp.float32)
    labels = np.array([0, 0, 1, 1, 2, 2, 3, 3], dtype=np.int32)  # target

    triplets = all_triplets_selector(labels)  # (48, 3)

    loss, num_triplets = online_triplet_loss_pallas(embeddings, triplets, margin)
    loss = jax.block_until_ready(loss)

    ref = jax.block_until_ready(
        reference_loss(embeddings, jnp.asarray(triplets), margin))
    assert num_triplets == triplets.shape[0]
    np.testing.assert_allclose(float(loss), float(ref), rtol=2e-3, atol=2e-3)

    print("KERNEL_OK")
</pallas_src>

<mosaic_0001>
module attributes {stable_mosaic.version = 11 : i64} {
  func.func @_fused_kernel(%arg0: i32, %arg1: memref<1xi32, #tpu.memory_space<smem>>, %arg2: memref<8x32xf32, #tpu.memory_space<vmem>>, %arg3: memref<3x256xi32, #tpu.memory_space<vmem>>, %arg4: memref<1x1x1xf32, #tpu.memory_space<vmem>>, %arg5: memref<8x8xf32, #tpu.memory_space<vmem>>) attributes {dimension_semantics = [#tpu.dimension_semantics<arbitrary>], iteration_bounds = array<i64: 1>, scalar_prefetch = 1 : i64, scratch_operands = 1 : i64, tpu.core_type = #tpu.core_type<tc>, window_params = [{pipeline_mode = #tpu.pipeline_mode<synchronous>, transform_indices = @transform_0, window_bounds = array<i64: 8, 32>}, {transform_indices = @transform_1, window_bounds = array<i64: 3, 256>}, {transform_indices = @transform_2, window_bounds = array<i64: 1, 1, 1>}]} {
    %c0_i32 = arith.constant 0 : i32
    %0 = arith.cmpi eq, %arg0, %c0_i32 : i32
    %1 = arith.extui %0 : i1 to i32
    %c0_i32_0 = arith.constant 0 : i32
    %2 = arith.cmpi ne, %1, %c0_i32_0 : i32
    scf.if %2 {
      %c0_15 = arith.constant 0 : index
      %c0_16 = arith.constant 0 : index
      %42 = vector.load %arg2[%c0_15, %c0_16] : memref<8x32xf32, #tpu.memory_space<vmem>>, vector<8x32xf32>
      %cst_17 = arith.constant dense<0.000000e+00> : vector<8x8xf32>
      %43 = tpu.matmul %42, %42, %cst_17 {dimension_numbers = #tpu.dot_dimension_numbers<[1], [1], [0], [0], [0, 0, 1, 0], [], []>} : vector<8x32xf32>, vector<8x32xf32>, vector<8x8xf32> -> vector<8x8xf32>
      %44 = tpu.iota {dimensions = array<i32: 0>} : vector<8x8xi32>
      %45 = tpu.iota {dimensions = array<i32: 1>} : vector<8x8xi32>
      %46 = arith.cmpi eq, %44, %45 : vector<8x8xi32>
      %47 = arith.extui %46 : vector<8x8xi1> to vector<8x8xi32>
      %48 = arith.sitofp %47 : vector<8x8xi32> to vector<8x8xf32>
      %49 = arith.mulf %43, %48 : vector<8x8xf32>
      %cst_18 = arith.constant dense<0.000000e+00> : vector<8xf32>
      %50 = vector.multi_reduction <add>, %49, %cst_18 [0] : vector<8x8xf32> to vector<8xf32>
      %51 = vector.shape_cast %50 : vector<8xf32> to vector<1x8xf32>
      %cst_19 = arith.constant 2.000000e+00 : f32
      %52 = vector.broadcast %cst_19 : f32 to vector<8x8xf32>
      %53 = arith.mulf %52, %43 : vector<8x8xf32>
      %54 = vector.broadcast %51 : vector<1x8xf32> to vector<8x8xf32>
      %55 = arith.subf %54, %53 : vector<8x8xf32>
      %c0_20 = arith.constant 0 : index
      %c0_21 = arith.constant 0 : index
      %56 = vector.load %arg5[%c0_20, %c0_21] : memref<8x8xf32, #tpu.memory_space<vmem>>, vector<8x8xf32>
      tpu.vector_store %arg5[%c0_20, %c0_21], %55 {strides = array<i32>} : memref<8x8xf32, #tpu.memory_space<vmem>>, vector<8x8xf32>,
    } else {
    }
    %c0 = arith.constant 0 : index
    %c0_1 = arith.constant 0 : index
    %3 = vector.load %arg5[%c0, %c0_1] : memref<8x8xf32, #tpu.memory_space<vmem>>, vector<8x8xf32>
    %c0_2 = arith.constant 0 : index
    %c0_3 = arith.constant 0 : index
    %4 = vector.load %arg3[%c0_2, %c0_3] : memref<3x256xi32, #tpu.memory_space<vmem>>, vector<1x256xi32>
    %c1 = arith.constant 1 : index
    %c0_4 = arith.constant 0 : index
    %5 = vector.load %arg3[%c1, %c0_4] : memref<3x256xi32, #tpu.memory_space<vmem>>, vector<1x256xi32>
    %c2 = arith.constant 2 : index
    %c0_5 = arith.constant 0 : index
    %6 = vector.load %arg3[%c2, %c0_5] : memref<3x256xi32, #tpu.memory_space<vmem>>, vector<1x256xi32>
    %7 = tpu.iota {dimensions = array<i32: 0>} : vector<8x256xi32>
    %8 = vector.broadcast %4 : vector<1x256xi32> to vector<8x256xi32>
    %9 = arith.cmpi eq, %7, %8 : vector<8x256xi32>
    %10 = arith.extui %9 : vector<8x256xi1> to vector<8x256xi32>
    %11 = arith.sitofp %10 : vector<8x256xi32> to vector<8x256xf32>
    %12 = vector.broadcast %5 : vector<1x256xi32> to vector<8x256xi32>
    %13 = arith.cmpi eq, %7, %12 : vector<8x256xi32>
    %14 = arith.extui %13 : vector<8x256xi1> to vector<8x256xi32>
    %15 = arith.sitofp %14 : vector<8x256xi32> to vector<8x256xf32>
    %16 = vector.broadcast %6 : vector<1x256xi32> to vector<8x256xi32>
    %17 = arith.cmpi eq, %7, %16 : vector<8x256xi32>
    %18 = arith.extui %17 : vector<8x256xi1> to vector<8x256xi32>
    %19 = arith.sitofp %18 : vector<8x256xi32> to vector<8x256xf32>
    %20 = arith.subf %15, %19 : vector<8x256xf32>
    %cst = arith.constant dense<0.000000e+00> : vector<8x256xf32>
    %21 = tpu.matmul %3, %20, %cst {dimension_numbers = #tpu.dot_dimension_numbers<[1], [0], [0], [1], [0, 0, 1, 1], [], []>} : vector<8x8xf32>, vector<8x256xf32>, vector<8x256xf32> -> vector<8x256xf32>
    %22 = arith.mulf %11, %21 : vector<8x256xf32>
    %cst_6 = arith.constant dense<0.000000e+00> : vector<256xf32>
    %23 = vector.multi_reduction <add>, %22, %cst_6 [0] : vector<8x256xf32> to vector<256xf32>
    %24 = vector.shape_cast %23 : vector<256xf32> to vector<1x256xf32>
    %cst_7 = arith.constant 1.000000e+00 : f32
    %25 = vector.broadcast %cst_7 : f32 to vector<1x256xf32>
    %26 = arith.addf %24, %25 : vector<1x256xf32>
    %cst_8 = arith.constant 0.000000e+00 : f32
    %27 = vector.broadcast %cst_8 : f32 to vector<1x256xf32>
    %28 = arith.maximumf %26, %27 : vector<1x256xf32>
    %29 = tpu.iota {dimensions = array<i32: 1>} : vector<1x256xi32>
    %c256_i32 = arith.constant 256 : i32
    %30 = arith.muli %arg0, %c256_i32 : i32
    %31 = vector.broadcast %30 : i32 to vector<1x256xi32>
    %32 = arith.addi %31, %29 : vector<1x256xi32>
    %c0_9 = arith.constant 0 : index
    %33 = memref.load %arg1[%c0_9] : memref<1xi32, #tpu.memory_space<smem>>
    %34 = vector.broadcast %33 : i32 to vector<1x256xi32>
    %35 = arith.cmpi slt, %32, %34 : vector<1x256xi32>
    %cst_10 = arith.constant 0.000000e+00 : f32
    %36 = vector.broadcast %cst_10 : f32 to vector<1x256xf32>
    %37 = arith.select %35, %28, %36 : vector<1x256xi1>, vector<1x256xf32>
    %cst_11 = arith.constant dense<0.000000e+00> : vector<1xf32>
    %38 = vector.multi_reduction <add>, %37, %cst_11 [1] : vector<1x256xf32> to vector<1xf32>
    %39 = vector.shape_cast %38 : vector<1xf32> to vector<1x1xf32>
    %40 = vector.shape_cast %39 : vector<1x1xf32> to vector<1x1x1xf32>
    %c0_12 = arith.constant 0 : index
    %c0_13 = arith.constant 0 : index
    %c0_14 = arith.constant 0 : index
    %41 = vector.load %arg4[%c0_12, %c0_13, %c0_14] : memref<1x1x1xf32, #tpu.memory_space<vmem>>, vector<1x1x1xf32>
    tpu.vector_store %arg4[%c0_12, %c0_13, %c0_14], %40 {strides = array<i32>} : memref<1x1x1xf32, #tpu.memory_space<vmem>>, vector<1x1x1xf32>,
    return
  }
  func.func @transform_0(%arg0: i32, %arg1: memref<1xi32, #tpu.memory_space<smem>>) -> (i32, i32) {
    %c0_i32 = arith.constant 0 : i32
    %c0_i32_0 = arith.constant 0 : i32
    %c0_i32_1 = arith.constant 0 : i32
    return %c0_i32, %c0_i32_0 : i32, i32
  }
  func.func @transform_1(%arg0: i32, %arg1: memref<1xi32, #tpu.memory_space<smem>>) -> (i32, i32) {
    %c0_i32 = arith.constant 0 : i32
    %c0_i32_0 = arith.constant 0 : i32
    return %c0_i32, %arg0 : i32, i32
  }
  func.func @transform_2(%arg0: i32, %arg1: memref<1xi32, #tpu.memory_space<smem>>) -> (i32, i32, i32) {
    %c0_i32 = arith.constant 0 : i32
    %c0_i32_0 = arith.constant 0 : i32
    %c0_i32_1 = arith.constant 0 : i32
    return %arg0, %c0_i32, %c0_i32_0 : i32, i32, i32
  }
}

</mosaic_0001>

<bundles_post_ra>
// kernel: tpu_custom_call.1
= control target key start
LH: loop header
LB: loop body
LE: loop exit
PB: predicated region body
PF: predicated region fallthrough
CT: control target
= control target key end

     0   :  { %9 = vsyncpa [#allocation6], 0  ;;  %s473_s0 = inlined_call_operand.<no memory space> [shape: s32[1], index: 0, kind: input, shape index: {}]   ;;  %s474_s1 = inlined_call_operand.hbm [shape: f32[8,32], index: 1, kind: input, shape index: {}]   ;;  %s475_s2 = inlined_call_operand.hbm [shape: s32[3,256], index: 2, kind: input, shape index: {}]   ;;  %s476_s3 = inlined_call_operand.hbm [shape: f32[1,1,1], index: 3, kind: output, shape index: {}]  }
   0x1   :  { %10 = vsyncpa [#allocation9], 0 }
   0x2   :  { %11 = vsyncpa [#allocation7], 0  ;;  %s409_s12 = smov [#allocation5]   ;;  %s410_s14 = smov [#allocation8]  }
   0x3   :  { %s18_s13 = sshll.u32 %s409_s12, 4  ;;  %s28_s15 = sshll.u32 %s410_s14, 4  ;;  %s19_s13 = int_to_ptr.vmem [resolvable:$true] %s18_s13  ;;  %s29_s15 = int_to_ptr.vmem [resolvable:$true] %s28_s15 }
   0x4   :  { %s337_s18 = scalar_lea.hbm %s474_s1, 128 }
   0x5   :  { %p338_p0 = scmp.ne.s32.totalorder %s474_s1, %s337_s18  ;;  %p341_p1 = scmp.lt.u32.totalorder %s337_s18, %s474_s1 }
   0x7   :  { %p343_p2 = pnand %p341_p1, %p338_p0 }
   0x9   :  { %346 = shalt.err (!%p343_p2)
}
   0xa   :  { %s347_s23 = scalar_lea.vmem %s19_s13, 128  ;;  %p352_p4 = scmp.lt.s32.totalorder %s19_s13, %s19_s13 }
   0xb   :  { %p348_p3 = scmp.ne.s32.totalorder %s19_s13, %s347_s23  ;;  %p353_p5 = scmp.lt.s32.totalorder %s347_s23, %s347_s23 }
   0xd   :  { %p354_p6 = por %p353_p5, %p352_p4 }
   0xf   :  { %p355_p7 = pnand %p354_p6, %p348_p3 }
  0x11   :  { %358 = shalt.err (!%p355_p7)
}
  0x12   :  { %21 = dma.hbm_to_vmem [thread:$0]  %s474_s1, 128, %s19_s13, [#allocation6]  }
  0x13   :  { %s359_s28 = scalar_lea.hbm %s475_s2, 128 }
  0x14   :  { %p360_p8 = scmp.ne.s32.totalorder %s475_s2, %s359_s28  ;;  %p363_p9 = scmp.lt.u32.totalorder %s359_s28, %s475_s2 }
  0x16   :  { %p365_p10 = pnand %p363_p9, %p360_p8 }
  0x18   :  { %368 = shalt.err (!%p365_p10)
}
  0x19   :  { %s369_s6 = scalar_lea.vmem %s29_s15, 128  ;;  %p374_p12 = scmp.lt.s32.totalorder %s29_s15, %s29_s15 }
  0x1a   :  { %p370_p11 = scmp.ne.s32.totalorder %s29_s15, %s369_s6  ;;  %p375_p13 = scmp.lt.s32.totalorder %s369_s6, %s369_s6 }
  0x1c   :  { %p376_p0 = por %p375_p13, %p374_p12 }
  0x1e   :  { %p377_p1 = pnand %p376_p0, %p370_p11 }
  0x20   :  { %380 = shalt.err (!%p377_p1)
}
  0x21   :  { %31 = dma.hbm_to_vmem [thread:$0]  %s475_s2, 128, %s29_s15, [#allocation9]  }
  0x22   :  { %403 = dma.done.wait [#allocation6], 128  }
  0x23   :  { %404 = vsyncadd [#allocation6], 4294967168 }
  0x24   :  { %405 = dma.done.wait [#allocation9], 128  }
  0x25   :  { %406 = vsyncadd [#allocation9], 4294967168  ;;  %v411_v0 = vmov 0.0   ;;  %vm412_vm0 = vmmov 0   ;;  %vm43_vm1 = vcmask 261120   ;;  %v42_v1 = vld [vmem:[#allocation5] sm:$0xff]  ;;  %v117_v2 = vlaneseq }
  0x26   :  { %327 = vmatprep.subr.mxu0 %v411_v0  ;;  %329 = vmatprep.mubr.msk.f32.mxu0 %vm412_vm0, %v411_v0  ;;  %v139_v4 = vld [vmem:[#allocation8 + $0x1] ss:$4 sm:$0x3]  ;;  %v141_v5 = vld [vmem:[#allocation8 + $0x2] ss:$4 sm:$0x3]  ;;  %v289_v54 = vstv %s473_s0 }
  0x27   :  { %256 = vmatprep.mubr.f32.mxu1 %v411_v0  ;;  %328 = vmatpush3.xpose.msk.msra.mxu0 %vm43_vm1, %v42_v1  ;;  %v118_v3 = vshrl.u32 %v117_v2, 7  ;;  %v120_v18 = vand.u32 127, %v117_v2  ;;  %vm125_vm7 = vcmask 64512   ;;  %v137_v33 = vld [vmem:[#allocation8] ss:$4 sm:$0x3] }
  0x28   :  { %s413_s9 = smov [#allocation10]   ;;  %vm297_vm12 = vcmask 0  }
  0x29   :  { %v150_v6 = vsub.s32 1, %v118_v3  ;;  %v146_v7 = vsub.s32 0, %v118_v3  ;;  %vm121_vm6 = vcmp.eq.s32.totalorder %v118_v3, %v120_v18  ;;  %v283_v53 = vadd.s32 128, %v120_v18  ;;  %s305_s10 = sshll.u32 %s413_s9, 4  ;;  %s306_s10 = int_to_ptr.vmem [resolvable:$true] %s305_s10 }
  0x2a   :  { %330 = vmatmul.mubr.msk.f32.vlgmr.msra.gmra.mrb[0].mxu0 %vm43_vm1, %v42_v1  ;;  %v317_v19 = vsel %vm121_vm6, 1.0, %v411_v0  ;;  %vm290_vm10 = vcmp.lt.s32.totalorder %v120_v18, %v289_v54  ;;  %s381_s11 = scalar_lea.vmem %s306_s10, 16  ;;  %s385_s0 = scalar_lea.vmem %s306_s10, 32 }
  0x2b   :  { %v165_v8 = vrot.slane %v139_v4, %v150_v6  ;;  %v179_v9 = vrot.slane %v141_v5, %v150_v6  ;;  %v161_v10 = vrot.slane %v139_v4, %v146_v7  ;;  %v175_v11 = vrot.slane %v141_v5, %v146_v7  ;;  %p382_p2 = scmp.ne.s32.totalorder %s306_s10, %s381_s11  ;;  %p386_p3 = scmp.lt.s32.totalorder %s306_s10, %s306_s10 }
  0x2c   :  { %v147_v34 = vrot.slane %v137_v33, %v146_v7  ;;  %v151_v35 = vrot.slane %v137_v33, %v150_v6  ;;  %vm291_vm11 = vcmp.lt.s32.totalorder %v283_v53, %v289_v54  ;;  %p387_p4 = scmp.lt.s32.totalorder %s385_s0, %s381_s11 }
  0x2d   :  { %vm167_vm2 = vcmp.eq.s32.totalorder %v118_v3, %v165_v8  ;;  %vm181_vm3 = vcmp.eq.s32.totalorder %v118_v3, %v179_v9  ;;  %vm166_vm4 = vcmp.eq.s32.totalorder %v118_v3, %v161_v10  ;;  %vm180_vm5 = vcmp.eq.s32.totalorder %v118_v3, %v175_v11 }
  0x2e   :  { %v321_v12 = vsel %vm167_vm2, 1.0, %v411_v0  ;;  %v323_v13 = vsel %vm181_vm3, 1.0, %v411_v0  ;;  %v320_v14 = vsel %vm166_vm4, 1.0, %v411_v0  ;;  %v322_v15 = vsel %vm180_vm5, 1.0, %v411_v0  ;;  %p388_p5 = por %p387_p4, %p386_p3 }
  0x2f   :  { %v187_v16 = vsub.f32 %v321_v12, %v323_v13  ;;  %v186_v17 = vsub.f32 %v320_v14, %v322_v15  ;;  %vm152_vm8 = vcmp.eq.s32.totalorder %v118_v3, %v147_v34  ;;  %vm153_vm9 = vcmp.eq.s32.totalorder %v118_v3, %v151_v35 }
  0x30   :  { %v318_v36 = vsel %vm152_vm8, 1.0, %v411_v0  ;;  %v319_v37 = vsel %vm153_vm9, 1.0, %v411_v0  ;;  %p389_p6 = pnand %p388_p5, %p382_p2 }
  0x31   :  { %192 = vmatprep.subr.mxu1 %v187_v16 }
  0x32   :  { %193 = vmatpush1.msra.mxu1 %v186_v17 }
  0xfd   :  { %v113_v20 = vpop.f32.mrb[0].mxu0 }
  0xfe   :  { %v124_v21 = vmul.f32 %v317_v19, %v113_v20  ;;  %v331_v22 = vpop.f32.mrb[1].mxu0  ;;  %v133_v29 = vmul.f32 2.0, %v113_v20 }
 0x100   :  { %v126_v23 = vsel %vm125_vm7, %v124_v21, 0.0 }
 0x101   :  { %v127_v24 = vrot.slane %v126_v23, 4 }
 0x103   :  { %v128_v25 = vadd.f32 %v127_v24, %v126_v23 }
 0x105   :  { %v129_v26 = vrot.slane %v128_v25, 2 }
 0x107   :  { %v130_v27 = vadd.f32 %v129_v26, %v128_v25 }
 0x109   :  { %v131_v28 = vrot.slane %v130_v27, 1 }
 0x10b   :  { %v132_v30 = vadd.f32 %v131_v28, %v130_v27 }
 0x10d   :  { %v134_v31 = vsub.f32 %v132_v30, %v133_v29 }
 0x10f   :  { %135 = vst.msk [vmem:[#allocation2] sm:$0xff] %vm125_vm7, %v134_v31 }
 0x116   :  { %v136_v32 = vld [vmem:[#allocation2] sm:$0xff] }
 0x117   :  { %324 = vmatmul.mubr.msk.f32.vlgmr.msra.gmra.mrb[0].mxu1 %vm125_vm7, %v136_v32 }
 0x1ea   :  { %v258_v38 = vpop.f32.mrb[0].mxu1 }
 0x1eb   :  { %v263_v39 = vmul.f32 %v318_v36, %v258_v38  ;;  %v260_v40 = vpop.f32.mrb[1].mxu1 }
 0x1ec   :  { %v264_v41 = vmul.f32 %v319_v37, %v260_v40 }
 0x1ed   :  { %v265_v42 = vrot.slane %v263_v39, 4 }
 0x1ee   :  { %v271_v43 = vrot.slane %v264_v41, 4 }
 0x1ef   :  { %v266_v44 = vadd.f32 %v265_v42, %v263_v39 }
 0x1f0   :  { %v272_v45 = vadd.f32 %v271_v43, %v264_v41 }
 0x1f1   :  { %v267_v46 = vrot.slane %v266_v44, 2 }
 0x1f2   :  { %v273_v47 = vrot.slane %v272_v45, 2 }
 0x1f3   :  { %v268_v48 = vadd.f32 %v267_v46, %v266_v44 }
 0x1f4   :  { %v274_v49 = vadd.f32 %v273_v47, %v272_v45 }
 0x1f5   :  { %v269_v50 = vrot.slane %v268_v48, 1 }
 0x1f6   :  { %v275_v51 = vrot.slane %v274_v49, 1 }
 0x1f7   :  { %v270_v52 = vadd.f32 %v269_v50, %v268_v48 }
 0x1f8   :  { %v276_v55 = vadd.f32 %v275_v51, %v274_v49 }
 0x1f9   :  { %v277_v56 = vadd.f32 1.0, %v270_v52 }
 0x1fa   :  { %v278_v57 = vadd.f32 1.0, %v276_v55 }
 0x1fb   :  { %v279_v58 = vmax.f32 %v277_v56, 0.0 }
 0x1fc   :  { %v280_v59 = vmax.f32 %v278_v57, 0.0 }
 0x1fd   :  { %v292_v60 = vsel %vm290_vm10, %v279_v58, 0.0 }
 0x1fe   :  { %v293_v61 = vsel %vm291_vm11, %v280_v59, 0.0 }
 0x1ff   :  { %v294_v62 = vadd.f32 %v293_v61, %v292_v60 }
 0x201   :  { %295 = vadd.xlane.f32.xlu0 %v294_v62 }
 0x28e   :  { %v296_v63 = vpop.xlane.xlu0 %295 }
 0x28f   :  { %298 = vst.msk [vmem:[#allocation10] sm:$0x1] %vm297_vm12, %v296_v63 }
 0x290   :  { %392 = shalt.err (!%p389_p6)
}
 0x291   :  { %s393_s14 = scalar_lea.hbm %s476_s3, 16 }
 0x292   :  { %p394_p7 = scmp.ne.s32.totalorder %s476_s3, %s393_s14  ;;  %p397_p8 = scmp.lt.u32.totalorder %s393_s14, %s476_s3 }
 0x294   :  { %p399_p9 = pnand %p397_p8, %p394_p7 }
 0x296   :  { %402 = shalt.err (!%p399_p9)
}
 0x297   :  { %308 = dma.vmem_to_hbm [thread:$0]  %s306_s10, 16, %s476_s3, [#allocation7]  }
 0x298   :  { %407 = dma.done.wait [#allocation7], 16  }
 0x299   :  { %408 = vsyncadd [#allocation7], 4294967280 }
 0x29a   :  { %312 = vsyncpa [#allocation6], 1 }
 0x29b   :  { %313 = vsyncpa [#allocation9], 1 }
 0x29c   :  { %314 = vsyncpa [#allocation7], 1 }

</bundles_post_ra>
